<compile_context>
chip_gen: v7x
topology: tpu7x:2x2x1
jax: 0.10.0
libtpu: 0.0.40
codegen_flags: <defaults>
</compile_context>

<pallas_src>
import numpy as np
import jax
import jax.numpy as jnp
from jax.experimental import pallas as pl
from jax.experimental.pallas import tpu as pltpu

SIZES = (1, 2, 3, 6)
LANE = 128
SUBLANE = 8


def _round_up(a, b):
    return (a + b - 1) // b * b


# --------------------------------------------------------------------------------------
# deterministic setup helpers (glue, plain numpy)
# --------------------------------------------------------------------------------------
def adaptive_pool_matrix(in_size, out_size):
    """M[r, i] such that pooled[i] = sum_r M[r, i] * x[r] (exact AdaptiveAvgPool windows)."""
    M = np.zeros((in_size, out_size), dtype=np.float32)
    for i in range(out_size):
        start = (i * in_size) // out_size
        end = -((-(i + 1) * in_size) // out_size)  # ceil((i+1)*in/out)
        M[start:end, i] = 1.0 / float(end - start)
    return M


def bilinear_matrix(out_size, in_size):
    """M[h, i]: 1-D bilinear (align_corners=False) weights, out[h] = sum_i M[h, i] * x[i]."""
    M = np.zeros((out_size, in_size), dtype=np.float32)
    scale = in_size / out_size
    for h in range(out_size):
        src = max((h + 0.5) * scale - 0.5, 0.0)
        x0 = min(int(np.floor(src)), in_size - 1)
        x1 = min(x0 + 1, in_size - 1)
        l1 = src - x0
        M[h, x0] += 1.0 - l1
        M[h, x1] += l1
    return M


# --------------------------------------------------------------------------------------
# Pallas kernel: fused upsample + (implicit) concat + bottleneck 1x1 conv + bias + ReLU
# Per (batch, row-tile) grid point:
#   x_ref  (1, T, C)          bf16  raw features (identity branch of the concat)
#   q_ref  (1, S_pad, Coutp)  bf16  all pooled priors already projected by folded weights
#   u_ref  (T, S_pad)         bf16  concatenated bilinear upsample matrices (row tile)
#   wx_ref (C, Coutp)         bf16  bottleneck weight block for the identity branch
#   b_ref  (1, Coutp)         f32   bottleneck bias
#   o_ref  (1, T, Coutp)      f32   output tile (lane-dense, Coutp multiple of 128)
# --------------------------------------------------------------------------------------
def psp_fused_kernel(x_ref, q_ref, u_ref, wx_ref, b_ref, o_ref):
    # all four pyramid priors in one small-contraction MXU matmul
    acc = jnp.dot(u_ref[...], q_ref[0], preferred_element_type=jnp.float32)
    # identity branch of the concat (raw feature map) through its bottleneck block
    acc = acc + jnp.dot(x_ref[0], wx_ref[...], preferred_element_type=jnp.float32)
    acc = acc + b_ref[...]                       # bias broadcast (f32)
    o_ref[0] = jnp.maximum(acc, 0.0).astype(o_ref.dtype)   # ReLU


# --------------------------------------------------------------------------------------
# wrapper (PyTorch-like NCHW in / NCHW out)
# --------------------------------------------------------------------------------------
def psp_module_forward(feats_nchw, params, sizes=SIZES, tile_hw=256):
    N, C, H, W = feats_nchw.shape
    Cout = params["wb"].shape[0]
    K = len(sizes)
    HW = H * W

    s_tot = sum(s * s for s in sizes)            # 1 + 4 + 9 + 36 = 50
    S_pad = _round_up(s_tot, 64)                 # single pad of the combined contraction
    Cout_pad = _round_up(Cout, LANE)             # lane-dense output stores
    tile_hw = min(tile_hw, _round_up(HW, SUBLANE))
    HW_pad = _round_up(HW, tile_hw)

    # TODO(synk): keep the surrounding network NHWC end-to-end to avoid these two HBM
    # round-trip transposes; NCHW is kept here only to match the PyTorch interface.
    x_nhwc = jnp.transpose(feats_nchw, (0, 2, 3, 1)).astype(jnp.float32)   # (N,H,W,C)
    x_flat = x_nhwc.reshape(N, HW, C)
    x_flat = jnp.pad(x_flat, ((0, 0), (0, HW_pad - HW), (0, 0)))

    wb = params["wb"]                            # (Cout, (K+1)*C)
    bias = params["bias"]                        # (Cout,)

    # glue: exact adaptive avg pool (tiny, <=6x6 maps) + fold the stage conv AND its
    # bottleneck weight block into one (C, Cout) matrix, projecting the pooled maps down
    # to (s^2, Cout) so the kernel only contracts over sum(s^2) columns.
    q_blocks, u_cols = [], []
    for idx, s in enumerate(sizes):
        Ph = jnp.asarray(adaptive_pool_matrix(H, s))                   # (H, s)
        Pw = jnp.asarray(adaptive_pool_matrix(W, s))                   # (W, s)
        pooled = jnp.einsum("hi,nhwc,wj->nijc", Ph, x_nhwc, Pw)        # (N, s, s, C)
        # W_fold[c, o] = sum_d ws[d, c] * wb[o, idx*C + d]
        w_fold = params["ws"][idx].T @ wb[:, idx * C:(idx + 1) * C].T  # (C, Cout)
        q = jnp.einsum("nijc,co->nijo", pooled, w_fold)                # (N, s, s, Cout)
        q_blocks.append(q.reshape(N, s * s, Cout))

        Ah = bilinear_matrix(H, s)
        Aw = bilinear_matrix(W, s)
        u_cols.append(np.kron(Ah, Aw))                                 # (HW, s^2)

    q_all = jnp.concatenate(q_blocks, axis=1)                          # (N, s_tot, Cout)
    q_all = jnp.pad(q_all, ((0, 0), (0, S_pad - s_tot), (0, Cout_pad - Cout)))

    u_all = np.concatenate(u_cols, axis=1)                             # (HW, s_tot)
    u_all = np.pad(u_all, ((0, HW_pad - HW), (0, S_pad - s_tot)))
    u_all = jnp.asarray(u_all)

    w_x = wb[:, K * C:].T                                              # (C, Cout)
    w_x = jnp.pad(w_x, ((0, 0), (0, Cout_pad - Cout)))
    bias_p = jnp.pad(bias, (0, Cout_pad - Cout)).reshape(1, Cout_pad).astype(jnp.float32)

    # bf16 for streamed / MXU-facing operands; the kernel accumulates in f32.
    x_bf = x_flat.astype(jnp.bfloat16)
    q_bf = q_all.astype(jnp.bfloat16)
    u_bf = u_all.astype(jnp.bfloat16)
    wx_bf = w_x.astype(jnp.bfloat16)

    n_rt = HW_pad // tile_hw

    out_flat = pl.pallas_call(
        psp_fused_kernel,
        out_shape=jax.ShapeDtypeStruct((N, HW_pad, Cout_pad), jnp.float32),
        grid=(N, n_rt),
        in_specs=[
            pl.BlockSpec((1, tile_hw, C), lambda n, r: (n, r, 0)),          # x row tile
            pl.BlockSpec((1, S_pad, Cout_pad), lambda n, r: (n, 0, 0)),     # priors (resident/batch)
            pl.BlockSpec((tile_hw, S_pad), lambda n, r: (r, 0)),            # upsample rows
            pl.BlockSpec((C, Cout_pad), lambda n, r: (0, 0)),               # identity weight (resident)
            pl.BlockSpec((1, Cout_pad), lambda n, r: (0, 0)),               # bias (resident)
        ],
        out_specs=pl.BlockSpec((1, tile_hw, Cout_pad), lambda n, r: (n, r, 0)),
        compiler_params=pltpu.CompilerParams(
            dimension_semantics=("parallel", "parallel"),
            vmem_limit_bytes=48 * 1024 * 1024,
        ),
    )(x_bf, q_bf, u_bf, wx_bf, bias_p)

    out = out_flat[:, :HW, :Cout].reshape(N, H, W, Cout)
    return jnp.transpose(out, (0, 3, 1, 2))                            # back to NCHW


# --------------------------------------------------------------------------------------
# pure-JAX f32 reference (same math as PyTorch, unfused) for a sanity check
# --------------------------------------------------------------------------------------
def psp_reference(feats_nchw, params, sizes=SIZES):
    N, C, H, W = feats_nchw.shape
    x_nhwc = jnp.transpose(feats_nchw, (0, 2, 3, 1)).astype(jnp.float32)
    priors = []
    for idx, s in enumerate(sizes):
        Ph = jnp.asarray(adaptive_pool_matrix(H, s))
        Pw = jnp.asarray(adaptive_pool_matrix(W, s))
        pooled = jnp.einsum("hi,nhwc,wj->nijc", Ph, x_nhwc, Pw)
        conved = jnp.einsum("nijc,dc->nijd", pooled, params["ws"][idx])
        Ah = jnp.asarray(bilinear_matrix(H, s))
        Aw = jnp.asarray(bilinear_matrix(W, s))
        up = jnp.einsum("hi,nijc,wj->nhwc", Ah, conved, Aw)
        priors.append(up)
    priors.append(x_nhwc)
    cat = jnp.concatenate(priors, axis=-1)                             # (N, H, W, (K+1)C)
    out = jnp.einsum("nhwc,oc->nhwo", cat, params["wb"]) + params["bias"]
    out = jnp.maximum(out, 0.0)
    return jnp.transpose(out, (0, 3, 1, 2))


# --------------------------------------------------------------------------------------
# deterministic parameter init (synthetic; shapes from PSPModule.__init__)
# --------------------------------------------------------------------------------------
def init_params(key, C, Cout, sizes=SIZES):
    keys = jax.random.split(key, len(sizes) + 2)
    ws = [jax.random.normal(keys[i], (C, C), jnp.float32) / np.sqrt(C)
          for i in range(len(sizes))]                                  # stage 1x1, no bias
    fan_in = C * (len(sizes) + 1)
    wb = jax.random.normal(keys[-2], (Cout, fan_in), jnp.float32) / np.sqrt(fan_in)
    bias = jax.random.normal(keys[-1], (Cout,), jnp.float32) * 0.01
    return {"ws": ws, "wb": wb, "bias": bias}


if __name__ == "__main__":
    key = jax.random.PRNGKey(0)
    k_x, k_p = jax.random.split(key)

    # small shapes: batch=2, features=32, H=W=20 (HW=400 -> padded to 2x256-row tiles),
    # out_features=96 (padded to 128 lanes inside the kernel, sliced back afterwards)
    N, C, H, W = 2, 32, 20, 20
    Cout = 96

    feats = jax.random.normal(k_x, (N, C, H, W), jnp.float32)          # NCHW like PyTorch
    params = init_params(k_p, C, Cout)

    out = psp_module_forward(feats, params)
    out = jax.block_until_ready(out)

    ref = psp_reference(feats, params)
    assert out.shape == (N, Cout, H, W)
    # bf16 operands with f32 accumulation -> loosened tolerance vs the f32 reference
    np.testing.assert_allclose(np.asarray(out), np.asarray(ref), rtol=2e-2, atol=2e-2)

    print("KERNEL_OK")
</pallas_src>

<mosaic_0001>
module attributes {stable_mosaic.version = 11 : i64} {
  func.func @psp_fused_kernel(%arg0: i32, %arg1: i32, %arg2: memref<1x256x32xbf16, #tpu.memory_space<vmem>>, %arg3: memref<1x64x128xbf16, #tpu.memory_space<vmem>>, %arg4: memref<256x64xbf16, #tpu.memory_space<vmem>>, %arg5: memref<32x128xbf16, #tpu.memory_space<vmem>>, %arg6: memref<1x128xf32, #tpu.memory_space<vmem>>, %arg7: memref<1x256x128xf32, #tpu.memory_space<vmem>>) attributes {dimension_semantics = [#tpu.dimension_semantics<parallel>, #tpu.dimension_semantics<parallel>], iteration_bounds = array<i64: 2, 2>, scalar_prefetch = 0 : i64, scratch_operands = 0 : i64, tpu.core_type = #tpu.core_type<tc>, window_params = [{transform_indices = @transform_0, window_bounds = array<i64: 1, 256, 32>}, {transform_indices = @transform_1, window_bounds = array<i64: 1, 64, 128>}, {transform_indices = @transform_2, window_bounds = array<i64: 256, 64>}, {pipeline_mode = #tpu.pipeline_mode<synchronous>, transform_indices = @transform_3, window_bounds = array<i64: 32, 128>}, {pipeline_mode = #tpu.pipeline_mode<synchronous>, transform_indices = @transform_4, window_bounds = array<i64: 1, 128>}, {transform_indices = @transform_5, window_bounds = array<i64: 1, 256, 128>}]} {
    %c0 = arith.constant 0 : index
    %c0_0 = arith.constant 0 : index
    %0 = vector.load %arg4[%c0, %c0_0] : memref<256x64xbf16, #tpu.memory_space<vmem>>, vector<256x64xbf16>
    %c0_1 = arith.constant 0 : index
    %c0_2 = arith.constant 0 : index
    %c0_3 = arith.constant 0 : index
    %1 = vector.load %arg3[%c0_1, %c0_2, %c0_3] : memref<1x64x128xbf16, #tpu.memory_space<vmem>>, vector<1x64x128xbf16>
    %2 = vector.shape_cast %1 : vector<1x64x128xbf16> to vector<64x128xbf16>
    %cst = arith.constant dense<0.000000e+00> : vector<256x128xf32>
    %3 = tpu.matmul %0, %2, %cst {dimension_numbers = #tpu.dot_dimension_numbers<[1], [0], [0], [1], [0, 0, 1, 1], [], []>} : vector<256x64xbf16>, vector<64x128xbf16>, vector<256x128xf32> -> vector<256x128xf32>
    %c0_4 = arith.constant 0 : index
    %c0_5 = arith.constant 0 : index
    %c0_6 = arith.constant 0 : index
    %4 = vector.load %arg2[%c0_4, %c0_5, %c0_6] : memref<1x256x32xbf16, #tpu.memory_space<vmem>>, vector<1x256x32xbf16>
    %5 = vector.shape_cast %4 : vector<1x256x32xbf16> to vector<256x32xbf16>
    %c0_7 = arith.constant 0 : index
    %c0_8 = arith.constant 0 : index
    %6 = vector.load %arg5[%c0_7, %c0_8] : memref<32x128xbf16, #tpu.memory_space<vmem>>, vector<32x128xbf16>
    %cst_9 = arith.constant dense<0.000000e+00> : vector<256x128xf32>
    %7 = tpu.matmul %5, %6, %cst_9 {dimension_numbers = #tpu.dot_dimension_numbers<[1], [0], [0], [1], [0, 0, 1, 1], [], []>} : vector<256x32xbf16>, vector<32x128xbf16>, vector<256x128xf32> -> vector<256x128xf32>
    %8 = arith.addf %3, %7 : vector<256x128xf32>
    %c0_10 = arith.constant 0 : index
    %c0_11 = arith.constant 0 : index
    %9 = vector.load %arg6[%c0_10, %c0_11] : memref<1x128xf32, #tpu.memory_space<vmem>>, vector<1x128xf32>
    %10 = vector.broadcast %9 : vector<1x128xf32> to vector<256x128xf32>
    %11 = arith.addf %8, %10 : vector<256x128xf32>
    %cst_12 = arith.constant 0.000000e+00 : f32
    %12 = vector.broadcast %cst_12 : f32 to vector<256x128xf32>
    %13 = arith.maximumf %11, %12 : vector<256x128xf32>
    %c0_13 = arith.constant 0 : index
    %c0_14 = arith.constant 0 : index
    %c0_15 = arith.constant 0 : index
    %14 = vector.load %arg7[%c0_13, %c0_14, %c0_15] : memref<1x256x128xf32, #tpu.memory_space<vmem>>, vector<1x256x128xf32>
    %15 = vector.shape_cast %14 : vector<1x256x128xf32> to vector<256x128xf32>
    %16 = vector.shape_cast %13 : vector<256x128xf32> to vector<1x256x128xf32>
    tpu.vector_store %arg7[%c0_13, %c0_14, %c0_15], %16 {strides = array<i32>} : memref<1x256x128xf32, #tpu.memory_space<vmem>>, vector<1x256x128xf32>,
    return
  }
  func.func @transform_0(%arg0: i32, %arg1: i32) -> (i32, i32, i32) {
    %c0_i32 = arith.constant 0 : i32
    %c0_i32_0 = arith.constant 0 : i32
    return %arg0, %arg1, %c0_i32 : i32, i32, i32
  }
  func.func @transform_1(%arg0: i32, %arg1: i32) -> (i32, i32, i32) {
    %c0_i32 = arith.constant 0 : i32
    %c0_i32_0 = arith.constant 0 : i32
    %c0_i32_1 = arith.constant 0 : i32
    return %arg0, %c0_i32, %c0_i32_0 : i32, i32, i32
  }
  func.func @transform_2(%arg0: i32, %arg1: i32) -> (i32, i32) {
    %c0_i32 = arith.constant 0 : i32
    %c0_i32_0 = arith.constant 0 : i32
    return %arg1, %c0_i32 : i32, i32
  }
  func.func @transform_3(%arg0: i32, %arg1: i32) -> (i32, i32) {
    %c0_i32 = arith.constant 0 : i32
    %c0_i32_0 = arith.constant 0 : i32
    %c0_i32_1 = arith.constant 0 : i32
    return %c0_i32, %c0_i32_0 : i32, i32
  }
  func.func @transform_4(%arg0: i32, %arg1: i32) -> (i32, i32) {
    %c0_i32 = arith.constant 0 : i32
    %c0_i32_0 = arith.constant 0 : i32
    %c0_i32_1 = arith.constant 0 : i32
    return %c0_i32, %c0_i32_0 : i32, i32
  }
  func.func @transform_5(%arg0: i32, %arg1: i32) -> (i32, i32, i32) {
    %c0_i32 = arith.constant 0 : i32
    %c0_i32_0 = arith.constant 0 : i32
    return %arg0, %arg1, %c0_i32 : i32, i32, i32
  }
}

</mosaic_0001>

<bundles_post_ra>
// kernel: tpu_custom_call.1
= control target key start
LH: loop header
LB: loop body
LE: loop exit
PB: predicated region body
PF: predicated region fallthrough
CT: control target
= control target key end

     0   :  { %10 = vsyncpa [#allocation3], 0  ;;  %s1990_s0 = inlined_call_operand.vmem [shape: bf16[2,512,32], index: 0, kind: input, shape index: {}]   ;;  %s1991_s1 = inlined_call_operand.vmem [shape: bf16[2,64,128], index: 1, kind: input, shape index: {}]   ;;  %s1992_s2 = inlined_call_operand.vmem [shape: bf16[512,64], index: 2, kind: input, shape index: {}]   ;;  %s1993_s3 = inlined_call_operand.vmem [shape: bf16[32,128], index: 3, kind: input, shape index: {}]   ;;  %s1994_s4 = inlined_call_operand.vmem [shape: f32[1,128], index: 4, kind: input, shape index: {}]   ;;  %s1995_s5 = inlined_call_operand.hbm [shape: f32[2,512,128], index: 5, kind: output, shape index: {}]  }
   0x1   :  { %12 = vsyncpa [#allocation3 + $0x1], 0  ;;  %s1691_s18 = smov 0   ;;  %s1693_s19 = smov 0  }
   0x2   :  { %s1695_s20 = smov 0   ;;  %s1697_s21 = smov 0  }
   0x3   :  { %s1699_s22 = smov 0   ;;  %s1701_s23 = smov 0  }
   0x4   :  { %s1703_s24 = smov 0   ;;  %s1705_s25 = smov 0  }
   0x5 LB: > { %s1214_s26 = sadd.s32 4294967295, %s1656_s25   ;;  %s1215_s27 = sadd.s32 4294967294, %s1656_s25   ;;  %s1656_s25 = sphi %s1705_s25, %s18_s25   ;;  %s1652_s24 = sphi %s1703_s24, %s2010_s24   ;;  %s1648_s23 = sphi %s1701_s23, %s2009_s23   ;;  %s1644_s22 = sphi %s1699_s22, %s2008_s22   ;;  %s1640_s21 = sphi %s1697_s21, %s2007_s21   ;;  %s1636_s20 = sphi %s1695_s20, %s2006_s20   ;;  %s1632_s19 = sphi %s1693_s19, %s2005_s19   ;;  %s1628_s18 = sphi %s1691_s18, %s2004_s18  }
   0x6   : > { %s27_s28 = sadd.s32 1, %s1648_s23  ;;  %s30_s29 = sadd.s32 1, %s1652_s24 }
   0x7   : > { %p28_p0 = scmp.ge.s32.totalorder %s27_s28, 2  ;;  %p171_p1 = scmp.ne.s32.totalorder %s1636_s20, %s1632_s19 }
   0x8   : > { %p172_p2 = scmp.eq.s32.totalorder %s1214_s26, 3  ;;  %p177_p5 = scmp.ne.s32.totalorder %s1632_s19, %s1628_s18 }
   0x9   : > { %s2012_s28 = smov (%p28_p0, %s27_s28), 0  ;;  %s2014_s29 = smov (!%p28_p0, %s30_s29), %s1652_s24 }
   0xa   : > { %1998 = sst [smem:[#allocation5_spill]] %s2012_s28  ;;  %s157_s30 = ssub.s32 %s1648_s23, %s2012_s28 }
   0xb   : > { %p1742_p3 = por %p172_p2, %p171_p1  ;;  %p32_p4 = scmp.ge.s32.totalorder %s2014_s29, 2 }
   0xc   : > { %p178_p6 = scmp.eq.s32.totalorder %s1215_s27, 3  ;;  %p1218_p7 = scmp.ge.s32.totalorder %s1656_s25, 1 }
   0xd   : > { %s2016_s29 = smov (%p32_p4, %s2014_s29), 0  ;;  %p232_p9 = scmp.lt.s32.totalorder %s1656_s25, 5 }
   0xe   : > { %2000 = sst [smem:[#allocation6_spill]] %s2016_s29  ;;  %p1751_p8 = por %p178_p6, %p177_p5 }
   0xf   : > { %s156_s8 = ssub.s32 %s1652_s24, %s2016_s29  ;;  %s161_s9 = sadd.s32 1, %s1636_s20 }
  0x10   : > { %s158_s10 = sor.u32 %s157_s30, %s156_s8  ;;  %p233_p10 = pnand %p1218_p7, %p232_p9 }
  0x11   : > { %p159_p11 = scmp.eq.s32.totalorder %s158_s10, 0  ;;  %s1763_s12 = sshll.u32 (!%p233_p10), %s1640_s21, 5  ;;  %v1526_v0 = vld [vmem:[%s1993_s3] sm:$0xff] (!%p233_p10)   ;;  %v1528_v1 = vld [vmem:[%s1993_s3 + $0x8] sm:$0xff] (!%p233_p10)   ;;  %vm465_vm0 = vcmask (!%p233_p10), 261120   ;;  %vm779_vm1 = vcmask (!%p233_p10), 523264  }
  0x12   : > { %236 = sbr.rel (%p233_p10) target bundleno = 338 (0x152), region = 40  ;;  %p275_p12 = scmp.lt.s32.totalorder (!%p233_p10), %s1644_s22, 1  ;;  %1343 = vmatprep.subr.bf16.mxu1 (!%p233_p10), %v1526_v0  ;;  %v1856_v46 = vld [vmem:[%s1994_s4] ss:$0 sm:$0xff] (!%p233_p10) }
  0x13   : > { %s1760_s11 = scalar_select %p159_p11, %s1636_s20, %s161_s9  }
  0x14   : > { %p277_p13 = scmp.lt.s32.totalorder (!%p233_p10), %s1763_s12, 63  ;;  %1344 = vmatpush3.bf16.msra.mxu1 (!%p233_p10), %v1526_v0  ;;  %s271_s28 = sand.u32 (!%p233_p10), 1, %s1632_s19  }
  0x15   : > { %1345 = vmatprep.subr.bf16.mxu1 (!%p233_p10), %v1528_v1  ;;  %s1300_s8 = sshll.u32 (!%p233_p10), %s1644_s22, 6 }
  0x16   : > { %s1105_s9 = sadd.s32 (!%p233_p10), %s1300_s8, %s1763_s12 }
  0x18   : > { %1346 = vmatpush3.bf16.msra.mxu1 (!%p233_p10), %v1528_v1 }
  0x19   : > { %s276_s17 = scalar_select %p275_p12, %s1644_s22, 1 }
  0x1a   : > { %s278_s26 = scalar_select %p277_p13, %s1763_s12, 63 }
  0x1b   : > { %s1221_s27 = sshll.u32 %s276_s17, 6  ;;  %s1304_s30 = sshll.u32 %s276_s17, 5 }
  0x1c   : > { %s280_s21 = sadd.s32 %s1221_s27, %s278_s26  ;;  %s288_s10 = scalar_lea.vmem %s1991_s1, %s1304_s30 }
  0x1d   : > { %s1222_s29 = sshll.u32 %s280_s21, 2  ;;  %s1226_s15 = sshll.u32 %s278_s26, 2  ;;  %v1524_v2 = vld [vmem:[%s288_s10] sm:$0xff]   ;;  %v1525_v3 = vld [vmem:[%s288_s10 + $0x8] sm:$0xff]   ;;  %v1527_v5 = vld [vmem:[%s288_s10 + $0x10] sm:$0xff]  }
  0x1e   : > { %s1781_s14 = scalar_lea.vmem %s1990_s0, %s1222_s29  ;;  %1379 = vmatprep.subr.bf16.mxu0 %v1524_v2  ;;  %s1786_s27 = scalar_lea.vmem %s1992_s2, %s1226_s15  ;;  %v1530_v8 = vld [vmem:[%s288_s10 + $0x18] sm:$0xff]  }
  0x1f   : > { %1380 = vmatpush3.bf16.msra.mxu0 %v1524_v2  ;;  %v1529_v4 = vld [vmem:[%s1781_s14] sm:$0xff]   ;;  %v1531_v6 = vld [vmem:[%s1781_s14 + $0x8] sm:$0xff]   ;;  %v1534_v9 = vld [vmem:[%s1781_s14 + $0x10] sm:$0xff]   ;;  %s1219_s30 = sshll.u32 %s271_s28, 8  ;;  %s1301_s22 = sshll.u32 %s1105_s9, 7 }
  0x20   : > { %1381 = vmatprep.subr.bf16.mxu0 %v1525_v3  ;;  %1347 = vmatprep.mubr.msk.bf16.mxu1 %vm465_vm0, %v1529_v4  ;;  %v1532_v7 = vld [vmem:[%s1786_s27] sm:$0xff]   ;;  %v1535_v10 = vld [vmem:[%s1781_s14 + $0x18] sm:$0xff]   ;;  %v1533_v12 = vld [vmem:[%s1786_s27 + $0x8] sm:$0xff]   ;;  %s1864_s21 = scalar_lea.vmem [#allocation2], %s1219_s30  ;;  %s1938_s15 = scalar_lea.sflag [#allocation3], %s271_s28 }
  0x21   : > { %1348 = vmatmul.mubr.msk.bf16.vlgmr.msra.gmra.mrb[0].mxu1 %vm465_vm0, %v1531_v6  ;;  %1387 = vmatprep.mubr.msk.bf16.mxu0 %vm779_vm1, %v1532_v7  ;;  %v1538_v11 = vld [vmem:[%s1781_s14 + $0x20] sm:$0xff]   ;;  %v1536_v13 = vld [vmem:[%s1786_s27 + $0x10] sm:$0xff]   ;;  %v1539_v14 = vld [vmem:[%s1781_s14 + $0x28] sm:$0xff]   ;;  %s1108_s12 = sshll.u32 %s1864_s21, 4  ;;  %s1658_s17 = smov [#allocation2]   ;;  %s1931_s12 = int_to_ptr.vmem [resolvable:$true] %s1108_s12 }
  0x22   : > { %1351 = vmatprep.mubr.msk.bf16.mxu1 %vm465_vm0, %v1534_v9  ;;  %v1542_v15 = vld [vmem:[%s1781_s14 + $0x30] sm:$0xff]   ;;  %v1537_v16 = vld [vmem:[%s1786_s27 + $0x18] sm:$0xff]   ;;  %v1540_v17 = vld [vmem:[%s1786_s27 + $0x20] sm:$0xff]   ;;  %s1562_s16 = scalar_lea.vmem %s1931_s12, 4096 }
  0x23   : > { %1382 = vmatpush3.bf16.msra.mxu0 %v1525_v3  ;;  %v1543_v18 = vld [vmem:[%s1781_s14 + $0x38] sm:$0xff]   ;;  %v1546_v19 = vld [vmem:[%s1781_s14 + $0x40] sm:$0xff]   ;;  %v1541_v20 = vld [vmem:[%s1786_s27 + $0x28] sm:$0xff]   ;;  %p1563_p0 = scmp.ne.s32.totalorder %s1931_s12, %s1562_s16 }
  0x24   : > { %1383 = vmatprep.subr.bf16.mxu0 %v1527_v5  ;;  %v1544_v21 = vld [vmem:[%s1786_s27 + $0x30] sm:$0xff]   ;;  %v1547_v22 = vld [vmem:[%s1781_s14 + $0x48] sm:$0xff]   ;;  %v1545_v24 = vld [vmem:[%s1786_s27 + $0x38] sm:$0xff]  }
  0x25   : > { %v1550_v23 = vld [vmem:[%s1781_s14 + $0x50] sm:$0xff]   ;;  %v1548_v25 = vld [vmem:[%s1786_s27 + $0x40] sm:$0xff]   ;;  %v1551_v26 = vld [vmem:[%s1781_s14 + $0x58] sm:$0xff]   ;;  %p1564_p1 = pnand %p1563_p0, %p1742_p3 }
  0x26   : > { %v1554_v27 = vld [vmem:[%s1781_s14 + $0x60] sm:$0xff]   ;;  %v1549_v28 = vld [vmem:[%s1786_s27 + $0x48] sm:$0xff]   ;;  %v1552_v29 = vld [vmem:[%s1786_s27 + $0x50] sm:$0xff]  }
  0x27   : > { %1384 = vmatpush3.bf16.msra.mxu0 %v1527_v5  ;;  %v1555_v30 = vld [vmem:[%s1781_s14 + $0x68] sm:$0xff]   ;;  %v1558_v31 = vld [vmem:[%s1781_s14 + $0x70] sm:$0xff]   ;;  %v1553_v32 = vld [vmem:[%s1786_s27 + $0x58] sm:$0xff]   ;;  %p1565_p2 = pneg %p1564_p1 }
  0x28   : > { %1385 = vmatprep.subr.bf16.mxu0 %v1530_v8  ;;  %v1556_v33 = vld [vmem:[%s1786_s27 + $0x60] sm:$0xff]   ;;  %v1559_v34 = vld [vmem:[%s1781_s14 + $0x78] sm:$0xff]   ;;  %v1557_v35 = vld [vmem:[%s1786_s27 + $0x68] sm:$0xff]   ;;  %s1927_s14 = scalar_lea.hbm %s1995_s5, %s1301_s22 }
  0x29   : > { %1352 = vmatmul.mubr.msk.bf16.gmra.mrb[4].mxu1 %vm465_vm0, %v1535_v10  ;;  %v1560_v36 = vld [vmem:[%s1786_s27 + $0x70] sm:$0xff]   ;;  %v1561_v37 = vld [vmem:[%s1786_s27 + $0x78] sm:$0xff]   ;;  %s1566_s27 = sshll.u32 %s1658_s17, 4  ;;  %s1567_s27 = int_to_ptr.vmem [resolvable:$false] %s1566_s27 }
  0x2a   : > { %1355 = vmatprep.mubr.msk.bf16.mxu1 %vm465_vm0, %v1538_v11  ;;  %s1568_s29 = scalar_lea.vmem %s1567_s27, 8192  ;;  %p1569_p4 = scmp.lt.s32.totalorder %s1931_s12, %s1567_s27 }
  0x2b   : > { %1386 = vmatpush3.bf16.msra.mxu0 %v1530_v8  ;;  %p1570_p5 = scmp.lt.s32.totalorder %s1568_s29, %s1562_s16 }
  0x2d   : > { %p1571_p6 = por %p1570_p5, %p1569_p4 }
  0x2e   : > { %1388 = vmatmul.mubr.msk.bf16.vlgmr.msra.gmra.mrb[0].mxu0 %vm779_vm1, %v1533_v12 }
  0x2f   : > { %1391 = vmatprep.mubr.msk.bf16.mxu0 %vm779_vm1, %v1536_v13  ;;  %p1572_p7 = pnand %p1571_p6, %p1565_p2 }
  0x31   : > { %1356 = vmatmul.mubr.msk.bf16.gmra.mrb[8].mxu1 %vm465_vm0, %v1539_v14 }
  0x32   : > { %1359 = vmatprep.mubr.msk.bf16.mxu1 %vm465_vm0, %v1542_v15 }
  0x36   : > { %1392 = vmatmul.mubr.msk.bf16.gmra.mrb[4].mxu0 %vm779_vm1, %v1537_v16 }
  0x37   : > { %1395 = vmatprep.mubr.msk.bf16.mxu0 %vm779_vm1, %v1540_v17 }
  0x39   : > { %1360 = vmatmul.mubr.msk.bf16.gmra.mrb[12].mxu1 %vm465_vm0, %v1543_v18 }
  0x3a   : > { %1363 = vmatprep.mubr.msk.bf16.mxu1 %vm465_vm0, %v1546_v19 }
  0x3e   : > { %1396 = vmatmul.mubr.msk.bf16.gmra.mrb[8].mxu0 %vm779_vm1, %v1541_v20 }
  0x3f   : > { %1399 = vmatprep.mubr.msk.bf16.mxu0 %vm779_vm1, %v1544_v21 }
  0x41   : > { %1364 = vmatmul.mubr.msk.bf16.gmra.mrb[16].mxu1 %vm465_vm0, %v1547_v22 }
  0x42   : > { %1367 = vmatprep.mubr.msk.bf16.mxu1 %vm465_vm0, %v1550_v23 }
  0x46   : > { %1400 = vmatmul.mubr.msk.bf16.gmra.mrb[12].mxu0 %vm779_vm1, %v1545_v24 }
  0x47   : > { %1403 = vmatprep.mubr.msk.bf16.mxu0 %vm779_vm1, %v1548_v25 }
  0x49   : > { %1368 = vmatmul.mubr.msk.bf16.gmra.mrb[20].mxu1 %vm465_vm0, %v1551_v26 }
  0x4a   : > { %1371 = vmatprep.mubr.msk.bf16.mxu1 %vm465_vm0, %v1554_v27 }
  0x4e   : > { %1404 = vmatmul.mubr.msk.bf16.gmra.mrb[16].mxu0 %vm779_vm1, %v1549_v28 }
  0x4f   : > { %1407 = vmatprep.mubr.msk.bf16.mxu0 %vm779_vm1, %v1552_v29 }
  0x51   : > { %1372 = vmatmul.mubr.msk.bf16.gmra.mrb[24].mxu1 %vm465_vm0, %v1555_v30 }
  0x52   : > { %1375 = vmatprep.mubr.msk.bf16.mxu1 %vm465_vm0, %v1558_v31 }
  0x56   : > { %1408 = vmatmul.mubr.msk.bf16.gmra.mrb[20].mxu0 %vm779_vm1, %v1553_v32 }
  0x57   : > { %1411 = vmatprep.mubr.msk.bf16.mxu0 %vm779_vm1, %v1556_v33 }
  0x59   : > { %1376 = vmatmul.mubr.msk.bf16.gmra.mrb[28].mxu1 %vm465_vm0, %v1559_v34 }
  0x5e   : > { %1412 = vmatmul.mubr.msk.bf16.gmra.mrb[24].mxu0 %vm779_vm1, %v1557_v35 }
  0x5f   : > { %1415 = vmatprep.mubr.msk.bf16.mxu0 %vm779_vm1, %v1560_v36 }
  0x66   : > { %1416 = vmatmul.mubr.msk.bf16.gmra.mrb[28].mxu0 %vm779_vm1, %v1561_v37 }
  0xf4   : > { %v1349_v38 = vpop.f32.mrb[0].mxu1 }
  0xf5   : > { %v548_v39 = vpop.f32.mrb[1].mxu1 }
  0xf6   : > { %v1350_v40 = vpop.f32.mrb[2].mxu1 }
  0xf7   : > { %v551_v41 = vpop.f32.mrb[3].mxu1 }
  0xfc   : > { %v1353_v42 = vpop.f32.mrb[4].mxu1 }
  0xfd   : > { %v564_v43 = vpop.f32.mrb[5].mxu1 }
  0xfe   : > { %v1354_v44 = vpop.f32.mrb[6].mxu1 }
  0xff   : > { %v567_v47 = vpop.f32.mrb[7].mxu1 }
 0x101   : > { %v1389_v45 = vpop.f32.mrb[0].mxu0 }
 0x102   : > { %v871_v48 = vadd.f32 %v1389_v45, %v1349_v38  ;;  %v862_v49 = vpop.f32.mrb[1].mxu0 }
 0x103   : > { %v863_v50 = vadd.f32 %v862_v49, %v548_v39  ;;  %v1390_v51 = vpop.f32.mrb[2].mxu0 }
 0x104   : > { %v998_v52 = vadd.f32 %v1856_v46, %v871_v48  ;;  %v874_v53 = vadd.f32 %v1390_v51, %v1350_v40  ;;  %v865_v54 = vpop.f32.mrb[3].mxu0  ;;  %v1357_v59 = vpop.f32.mrb[8].mxu1 }
 0x105   : > { %v996_v55 = vadd.f32 %v1856_v46, %v863_v50  ;;  %v866_v56 = vadd.f32 %v865_v54, %v551_v41  ;;  %v580_v62 = vpop.f32.mrb[9].mxu1 }
 0x106   : > { %v1030_v57 = vmax.f32 %v998_v52, 0.0  ;;  %v999_v58 = vadd.f32 %v1856_v46, %v874_v53  ;;  %v1358_v0 = vpop.f32.mrb[10].mxu1 }
 0x107   : > { %v1028_v60 = vmax.f32 %v996_v55, 0.0  ;;  %v997_v61 = vadd.f32 %v1856_v46, %v866_v56  ;;  %v583_v3 = vpop.f32.mrb[11].mxu1 }
 0x108   : > { %1062 = vst [vmem:[%s1864_s21 + $0x10] sm:$0xff] %v1030_v57  ;;  %v1031_v63 = vmax.f32 %v999_v58, 0.0 }
 0x109   : > { %1060 = vst [vmem:[%s1864_s21] sm:$0xff] %v1028_v60  ;;  %v1029_v1 = vmax.f32 %v997_v61, 0.0  ;;  %v1393_v2 = vpop.f32.mrb[4].mxu0 }
 0x10a   : > { %1063 = vst [vmem:[%s1864_s21 + $0x18] sm:$0xff] %v1031_v63  ;;  %v887_v4 = vadd.f32 %v1393_v2, %v1353_v42  ;;  %v878_v5 = vpop.f32.mrb[5].mxu0 }
 0x10b   : > { %1061 = vst [vmem:[%s1864_s21 + $0x8] sm:$0xff] %v1029_v1  ;;  %v879_v6 = vadd.f32 %v878_v5, %v564_v43  ;;  %v1394_v7 = vpop.f32.mrb[6].mxu0 }
 0x10c   : > { %v1002_v8 = vadd.f32 %v1856_v46, %v887_v4  ;;  %v890_v9 = vadd.f32 %v1394_v7, %v1354_v44  ;;  %v881_v10 = vpop.f32.mrb[7].mxu0  ;;  %v1361_v15 = vpop.f32.mrb[12].mxu1 }
 0x10d   : > { %v1000_v11 = vadd.f32 %v1856_v46, %v879_v6  ;;  %v882_v12 = vadd.f32 %v881_v10, %v567_v47  ;;  %v596_v18 = vpop.f32.mrb[13].mxu1 }
 0x10e   : > { %v1034_v13 = vmax.f32 %v1002_v8, 0.0  ;;  %v1003_v14 = vadd.f32 %v1856_v46, %v890_v9  ;;  %v1362_v20 = vpop.f32.mrb[14].mxu1 }
 0x10f   : > { %v1032_v16 = vmax.f32 %v1000_v11, 0.0  ;;  %v1001_v17 = vadd.f32 %v1856_v46, %v882_v12  ;;  %v599_v23 = vpop.f32.mrb[15].mxu1 }
 0x110   : > { %1066 = vst [vmem:[%s1864_s21 + $0x30] sm:$0xff] %v1034_v13  ;;  %v1035_v19 = vmax.f32 %v1003_v14, 0.0 }
 0x111   : > { %1064 = vst [vmem:[%s1864_s21 + $0x20] sm:$0xff] %v1032_v16  ;;  %v1033_v21 = vmax.f32 %v1001_v17, 0.0  ;;  %v1397_v22 = vpop.f32.mrb[8].mxu0 }
 0x112   : > { %1067 = vst [vmem:[%s1864_s21 + $0x38] sm:$0xff] %v1035_v19  ;;  %v903_v24 = vadd.f32 %v1397_v22, %v1357_v59  ;;  %v894_v25 = vpop.f32.mrb[9].mxu0 }
 0x113   : > { %1065 = vst [vmem:[%s1864_s21 + $0x28] sm:$0xff] %v1033_v21  ;;  %v895_v26 = vadd.f32 %v894_v25, %v580_v62  ;;  %v1398_v27 = vpop.f32.mrb[10].mxu0 }
 0x114   : > { %v1006_v28 = vadd.f32 %v1856_v46, %v903_v24  ;;  %v906_v29 = vadd.f32 %v1398_v27, %v1358_v0  ;;  %v897_v30 = vpop.f32.mrb[11].mxu0  ;;  %v1365_v35 = vpop.f32.mrb[16].mxu1 }
 0x115   : > { %v1004_v31 = vadd.f32 %v1856_v46, %v895_v26  ;;  %v898_v32 = vadd.f32 %v897_v30, %v583_v3  ;;  %v612_v38 = vpop.f32.mrb[17].mxu1 }
 0x116   : > { %v1038_v33 = vmax.f32 %v1006_v28, 0.0  ;;  %v1007_v34 = vadd.f32 %v1856_v46, %v906_v29  ;;  %v1366_v40 = vpop.f32.mrb[18].mxu1 }
 0x117   : > { %v1036_v36 = vmax.f32 %v1004_v31, 0.0  ;;  %v1005_v37 = vadd.f32 %v1856_v46, %v898_v32  ;;  %v615_v43 = vpop.f32.mrb[19].mxu1 }
 0x118   : > { %1070 = vst [vmem:[%s1864_s21 + $0x50] sm:$0xff] %v1038_v33  ;;  %v1039_v39 = vmax.f32 %v1007_v34, 0.0 }
 0x119   : > { %1068 = vst [vmem:[%s1864_s21 + $0x40] sm:$0xff] %v1036_v36  ;;  %v1037_v41 = vmax.f32 %v1005_v37, 0.0  ;;  %v1401_v42 = vpop.f32.mrb[12].mxu0 }
 0x11a   : > { %1071 = vst [vmem:[%s1864_s21 + $0x58] sm:$0xff] %v1039_v39  ;;  %v919_v44 = vadd.f32 %v1401_v42, %v1361_v15  ;;  %v910_v45 = vpop.f32.mrb[13].mxu0 }
 0x11b   : > { %1069 = vst [vmem:[%s1864_s21 + $0x48] sm:$0xff] %v1037_v41  ;;  %v911_v47 = vadd.f32 %v910_v45, %v596_v18  ;;  %v1402_v48 = vpop.f32.mrb[14].mxu0 }
 0x11c   : > { %v1010_v49 = vadd.f32 %v1856_v46, %v919_v44  ;;  %v922_v50 = vadd.f32 %v1402_v48, %v1362_v20  ;;  %v913_v51 = vpop.f32.mrb[15].mxu0  ;;  %v1369_v56 = vpop.f32.mrb[20].mxu1 }
 0x11d   : > { %v1008_v52 = vadd.f32 %v1856_v46, %v911_v47  ;;  %v914_v53 = vadd.f32 %v913_v51, %v599_v23  ;;  %v628_v59 = vpop.f32.mrb[21].mxu1 }
 0x11e   : > { %v1042_v54 = vmax.f32 %v1010_v49, 0.0  ;;  %v1011_v55 = vadd.f32 %v1856_v46, %v922_v50  ;;  %v1370_v61 = vpop.f32.mrb[22].mxu1 }
 0x11f   : > { %v1040_v57 = vmax.f32 %v1008_v52, 0.0  ;;  %v1009_v58 = vadd.f32 %v1856_v46, %v914_v53  ;;  %v631_v0 = vpop.f32.mrb[23].mxu1 }
 0x120   : > { %1074 = vst [vmem:[%s1864_s21 + $0x70] sm:$0xff] %v1042_v54  ;;  %v1043_v60 = vmax.f32 %v1011_v55, 0.0 }
 0x121   : > { %1072 = vst [vmem:[%s1864_s21 + $0x60] sm:$0xff] %v1040_v57  ;;  %v1041_v62 = vmax.f32 %v1009_v58, 0.0  ;;  %v1405_v63 = vpop.f32.mrb[16].mxu0 }
 0x122   : > { %1075 = vst [vmem:[%s1864_s21 + $0x78] sm:$0xff] %v1043_v60  ;;  %v935_v1 = vadd.f32 %v1405_v63, %v1365_v35  ;;  %v926_v2 = vpop.f32.mrb[17].mxu0 }
 0x123   : > { %1073 = vst [vmem:[%s1864_s21 + $0x68] sm:$0xff] %v1041_v62  ;;  %v927_v3 = vadd.f32 %v926_v2, %v612_v38  ;;  %v1406_v4 = vpop.f32.mrb[18].mxu0 }
 0x124   : > { %v1014_v5 = vadd.f32 %v1856_v46, %v935_v1  ;;  %v938_v6 = vadd.f32 %v1406_v4, %v1366_v40  ;;  %v929_v7 = vpop.f32.mrb[19].mxu0  ;;  %v1373_v12 = vpop.f32.mrb[24].mxu1 }
 0x125   : > { %v1012_v8 = vadd.f32 %v1856_v46, %v927_v3  ;;  %v930_v9 = vadd.f32 %v929_v7, %v615_v43  ;;  %v644_v15 = vpop.f32.mrb[25].mxu1 }
 0x126   : > { %v1046_v10 = vmax.f32 %v1014_v5, 0.0  ;;  %v1015_v11 = vadd.f32 %v1856_v46, %v938_v6  ;;  %v1374_v17 = vpop.f32.mrb[26].mxu1 }
 0x127   : > { %v1044_v13 = vmax.f32 %v1012_v8, 0.0  ;;  %v1013_v14 = vadd.f32 %v1856_v46, %v930_v9  ;;  %v647_v20 = vpop.f32.mrb[27].mxu1 }
 0x128   : > { %1078 = vst [vmem:[%s1864_s21 + $0x90] sm:$0xff] %v1046_v10  ;;  %v1047_v16 = vmax.f32 %v1015_v11, 0.0 }
 0x129   : > { %1076 = vst [vmem:[%s1864_s21 + $0x80] sm:$0xff] %v1044_v13  ;;  %v1045_v18 = vmax.f32 %v1013_v14, 0.0  ;;  %v1409_v19 = vpop.f32.mrb[20].mxu0 }
 0x12a   : > { %1079 = vst [vmem:[%s1864_s21 + $0x98] sm:$0xff] %v1047_v16  ;;  %v951_v21 = vadd.f32 %v1409_v19, %v1369_v56  ;;  %v942_v22 = vpop.f32.mrb[21].mxu0 }
 0x12b   : > { %1077 = vst [vmem:[%s1864_s21 + $0x88] sm:$0xff] %v1045_v18  ;;  %v943_v23 = vadd.f32 %v942_v22, %v628_v59  ;;  %v1410_v24 = vpop.f32.mrb[22].mxu0 }
 0x12c   : > { %v1018_v25 = vadd.f32 %v1856_v46, %v951_v21  ;;  %v954_v26 = vadd.f32 %v1410_v24, %v1370_v61  ;;  %v945_v27 = vpop.f32.mrb[23].mxu0  ;;  %v1377_v32 = vpop.f32.mrb[28].mxu1 }
 0x12d   : > { %v1016_v28 = vadd.f32 %v1856_v46, %v943_v23  ;;  %v946_v29 = vadd.f32 %v945_v27, %v631_v0  ;;  %v660_v35 = vpop.f32.mrb[29].mxu1 }
 0x12e   : > { %v1050_v30 = vmax.f32 %v1018_v25, 0.0  ;;  %v1019_v31 = vadd.f32 %v1856_v46, %v954_v26  ;;  %v1378_v37 = vpop.f32.mrb[30].mxu1 }
 0x12f   : > { %v1048_v33 = vmax.f32 %v1016_v28, 0.0  ;;  %v1017_v34 = vadd.f32 %v1856_v46, %v946_v29  ;;  %v663_v40 = vpop.f32.mrb[31].mxu1 }
 0x130   : > { %1082 = vst [vmem:[%s1864_s21 + $0xb0] sm:$0xff] %v1050_v30  ;;  %v1051_v36 = vmax.f32 %v1019_v31, 0.0 }
 0x131   : > { %1080 = vst [vmem:[%s1864_s21 + $0xa0] sm:$0xff] %v1048_v33  ;;  %v1049_v38 = vmax.f32 %v1017_v34, 0.0  ;;  %v1413_v39 = vpop.f32.mrb[24].mxu0 }
 0x132   : > { %1083 = vst [vmem:[%s1864_s21 + $0xb8] sm:$0xff] %v1051_v36  ;;  %v967_v41 = vadd.f32 %v1413_v39, %v1373_v12  ;;  %v958_v42 = vpop.f32.mrb[25].mxu0 }
 0x133   : > { %1081 = vst [vmem:[%s1864_s21 + $0xa8] sm:$0xff] %v1049_v38  ;;  %v959_v43 = vadd.f32 %v958_v42, %v644_v15  ;;  %v1414_v44 = vpop.f32.mrb[26].mxu0 }
 0x134   : > { %v1022_v45 = vadd.f32 %v1856_v46, %v967_v41  ;;  %v970_v47 = vadd.f32 %v1414_v44, %v1374_v17  ;;  %v961_v48 = vpop.f32.mrb[27].mxu0 }
 0x135   : > { %v1020_v49 = vadd.f32 %v1856_v46, %v959_v43  ;;  %v962_v50 = vadd.f32 %v961_v48, %v647_v20 }
 0x136   : > { %v1054_v51 = vmax.f32 %v1022_v45, 0.0  ;;  %v1023_v52 = vadd.f32 %v1856_v46, %v970_v47 }
 0x137   : > { %v1052_v53 = vmax.f32 %v1020_v49, 0.0  ;;  %v1021_v54 = vadd.f32 %v1856_v46, %v962_v50 }
 0x138   : > { %1086 = vst [vmem:[%s1864_s21 + $0xd0] sm:$0xff] %v1054_v51  ;;  %v1055_v55 = vmax.f32 %v1023_v52, 0.0 }
 0x139   : > { %1084 = vst [vmem:[%s1864_s21 + $0xc0] sm:$0xff] %v1052_v53  ;;  %v1053_v56 = vmax.f32 %v1021_v54, 0.0  ;;  %v1417_v57 = vpop.f32.mrb[28].mxu0 }
 0x13a   : > { %1087 = vst [vmem:[%s1864_s21 + $0xd8] sm:$0xff] %v1055_v55  ;;  %v983_v58 = vadd.f32 %v1417_v57, %v1377_v32  ;;  %v974_v59 = vpop.f32.mrb[29].mxu0 }
 0x13b   : > { %1085 = vst [vmem:[%s1864_s21 + $0xc8] sm:$0xff] %v1053_v56  ;;  %v975_v60 = vadd.f32 %v974_v59, %v660_v35  ;;  %v1418_v61 = vpop.f32.mrb[30].mxu0 }
 0x13c   : > { %v1026_v62 = vadd.f32 %v1856_v46, %v983_v58  ;;  %v986_v63 = vadd.f32 %v1418_v61, %v1378_v37  ;;  %v977_v0 = vpop.f32.mrb[31].mxu0 }
 0x13d   : > { %v1024_v1 = vadd.f32 %v1856_v46, %v975_v60  ;;  %v978_v2 = vadd.f32 %v977_v0, %v663_v40 }
 0x13e   : > { %v1058_v3 = vmax.f32 %v1026_v62, 0.0  ;;  %v1027_v4 = vadd.f32 %v1856_v46, %v986_v63 }
 0x13f   : > { %v1056_v5 = vmax.f32 %v1024_v1, 0.0  ;;  %v1025_v6 = vadd.f32 %v1856_v46, %v978_v2 }
 0x140   : > { %1090 = vst [vmem:[%s1864_s21 + $0xf0] sm:$0xff] %v1058_v3  ;;  %v1059_v7 = vmax.f32 %v1027_v4, 0.0 }
 0x141   : > { %1088 = vst [vmem:[%s1864_s21 + $0xe0] sm:$0xff] %v1056_v5  ;;  %v1057_v8 = vmax.f32 %v1025_v6, 0.0 }
 0x142   : > { %1091 = vst [vmem:[%s1864_s21 + $0xf8] sm:$0xff] %v1059_v7 }
 0x143   : > { %1089 = vst [vmem:[%s1864_s21 + $0xe8] sm:$0xff] %v1057_v8 }
 0x144   : > { %1575 = shalt.err (!%p1572_p7)
}
 0x145   : > { %s1576_s28 = scalar_lea.hbm %s1927_s14, 4096  ;;  %s1580_s21 = scalar_lea.hbm %s1995_s5, 16384 }
 0x146   : > { %p1577_p9 = scmp.ne.s32.totalorder %s1927_s14, %s1576_s28  ;;  %p1581_p12 = scmp.lt.u32.totalorder %s1927_s14, %s1995_s5 }
 0x147   : > { %p1582_p13 = scmp.lt.u32.totalorder %s1580_s21, %s1576_s28  ;;  %p1584_p1 = scmp.lt.u32.totalorder %s1576_s28, %s1927_s14 }
 0x148   : > { %p1578_p10 = pnand %p1577_p9, %p1742_p3 }
 0x149   : > { %p1583_p0 = por %p1582_p13, %p1581_p12 }
 0x14a   : > { %p1579_p11 = pneg %p1578_p10 }
 0x14b   : > { %p1585_p2 = por %p1584_p1, %p1583_p0 }
 0x14d   : > { %p1586_p4 = pnand %p1585_p2, %p1579_p11 }
 0x14f   : > { %1589 = shalt.err (!%p1586_p4)
}
 0x150   : > { %s1659_s22 = smov 128   ;;  %s1660_s10 = smov 8  }
 0x151   : > { %1451 = dma.vmem_to_hbm [thread:$0]  (%p1742_p3), %s1931_s12, 4096, %s1927_s14, %s1938_s15, %s1659_s22, %s1659_s22, %s1660_s10  }
 0x152 PF: > { %p1457_p5 = scmp.ge.s32.totalorder %s1656_s25, 2  ;;  %s1123_s13 = sand.u32 1, %s1628_s18  }
 0x153   : > { %s1124_s16 = scalar_lea.sflag [#allocation3], %s1123_s13 }
 0x154   : > { %p1454_p6 = pnand %p1457_p5, %p1751_p8 }
 0x156   : > { %1623 = dma.done.wait (!%p1454_p6), %s1124_s16, 4096  }
 0x157   : > { %1625 = vsyncadd (!%p1454_p6), %s1124_s16, 4294963200  ;;  %s18_s25 = sadd.s32 1, %s1656_s25   ;;  %s2002_s6 = sld [smem:[#allocation5_spill]] }
 0x158   : > { %p15_p7 = scmp.ge.s32.totalorder %s18_s25, 6   ;;  %s2003_s12 = sld [smem:[#allocation6_spill]] }
 0x159   : > { %s2004_s18 = smov %s1632_s19  ;;  %s2005_s19 = smov %s1636_s20 }
 0x15a   : > { %s2006_s20 = smov %s1760_s11  ;;  %s2007_s21 = smov %s1648_s23 }
 0x15b   : > { %s2008_s22 = smov %s1652_s24  ;;  %17 = sbr.rel (!%p15_p7) target bundleno = 5 (0x5), region = 81 }
 0x15d   : > { %s2009_s23 = smov %s2002_s6 }
 0x15e   : > { %s2010_s24 = smov %s2003_s12 }
 0x162   :  { %1129 = vsyncpa [#allocation3], 1 }
 0x163   :  { %1131 = vsyncpa [#allocation3 + $0x1], 1 }

</bundles_post_ra>
